<compile_context>
chip_gen: v7x
topology: tpu7x:2x2x1
jax: 0.10.0
libtpu: 0.0.40
codegen_flags: <defaults>
</compile_context>

<pallas_src>
import jax
import jax.numpy as jnp
from jax.experimental import pallas as pl
from jax.experimental.pallas import tpu as pltpu


_LOG2 = 0.6931471805599453


def _softplus(x):
    # numerically stable softplus (the shifted-softplus -log(2) is folded into b2)
    return jnp.maximum(x, 0.0) + jnp.log1p(jnp.exp(-jnp.abs(x)))


def _round_up(n, m):
    return -(-n // m) * m


def _block_diag(w, p):
    """Block-diagonal [[w,0,..],[0,w,..],..] with p copies of w on the diagonal."""
    if p == 1:
        return w
    a, b = w.shape
    eye = jnp.eye(p, dtype=w.dtype)
    return (eye[:, None, :, None] * w[None, :, None, :]).reshape(p * a, p * b)


def _pick_tile(n_rows, bytes_in_per_row, bytes_out_per_row, gran, budget_bytes):
    """Largest row-tile whose double-buffered in+out VMEM blocks fit `budget_bytes`,
    capped so the 1-D grid keeps >= 4 steps (feeds both v7x TensorCores through
    dimension_semantics=("parallel",)) whenever there is enough work."""
    per_row = 2 * (bytes_in_per_row + bytes_out_per_row)      # x2: double buffering
    t = max(gran, budget_bytes // per_row)
    t = min(t, max(gran, _round_up(pl.cdiv(n_rows, 4), gran)))
    t = max(gran, (t // gran) * gran)
    if t >= n_rows:
        return n_rows                                         # single full block
    return t


# ----------------------------------- kernels -----------------------------------

def _mlp_kernel(x_ref, w1_ref, b1_ref, w2_ref, b2_ref, y_ref):
    """Dense -> softplus -> Dense on one atom tile (packed or plain layout)."""
    h = jnp.dot(x_ref[...], w1_ref[...], preferred_element_type=jnp.float32)
    h = _softplus(h + b1_ref[...])
    y = jnp.dot(h, w2_ref[...], preferred_element_type=jnp.float32) + b2_ref[...]
    y_ref[...] = y.astype(y_ref.dtype)


def _mlp_n1_kernel(x_ref, w1_ref, b1_ref, w2r_ref, b2_ref, y_ref):
    """Unpacked n_out == 1 path: VPU mul + lane reduce, lane-dense 1-D output."""
    h = jnp.dot(x_ref[...], w1_ref[...], preferred_element_type=jnp.float32)
    h = _softplus(h + b1_ref[...])
    y = jnp.sum(h * w2r_ref[...], axis=1) + b2_ref[0, 0]
    y_ref[...] = y.astype(y_ref.dtype)


# --------------------------------- pallas wrappers ------------------------------

def _run_mlp(x_in, w1_in, b1, w2, b2, *, vmem_budget_bytes):
    """(rows, k) -> Dense -> softplus -> Dense -> (rows, n_out) f32."""
    m, k = x_in.shape
    n_hid = w1_in.shape[1]
    n_o = w2.shape[1]
    in_bytes = _round_up(k, 128) * x_in.dtype.itemsize         # lane-padded row
    out_bytes = _round_up(n_o, 128) * 4                        # f32 out, lane padded
    gran = 16 if x_in.dtype == jnp.bfloat16 else 8             # bf16 tiling is (16,128)
    tile = _pick_tile(m, in_bytes, out_bytes, gran, vmem_budget_bytes)
    grid = (pl.cdiv(m, tile),)
    block_bytes = 2 * tile * (in_bytes + out_bytes)            # double-buffered blocks
    vmem_limit = int(min(48 << 20, max(20 << 20, block_bytes + (8 << 20))))
    # TODO(synk): on v5e a pipeline_mode=pl.Buffered(3) on the x BlockSpec would hide
    # more of the per-step DMA at ~0.8 TB/s HBM; left at the default depth here.
    return pl.pallas_call(
        _mlp_kernel,
        out_shape=jax.ShapeDtypeStruct((m, n_o), jnp.float32),
        grid=grid,
        in_specs=[
            pl.BlockSpec((tile, k), lambda i: (i, 0)),
            pl.BlockSpec((k, n_hid), lambda i: (0, 0)),
            pl.BlockSpec((1, n_hid), lambda i: (0, 0)),
            pl.BlockSpec((n_hid, n_o), lambda i: (0, 0)),
            pl.BlockSpec((1, n_o), lambda i: (0, 0)),
        ],
        out_specs=pl.BlockSpec((tile, n_o), lambda i: (i, 0)),
        compiler_params=pltpu.CompilerParams(
            dimension_semantics=("parallel",),
            vmem_limit_bytes=vmem_limit),
    )(x_in, w1_in, b1, w2, b2)


def _run_mlp_n1(x_in, w1_in, b1, w2_row, b2_scalar, *, vmem_budget_bytes):
    """Unpacked n_out==1 path with a lane-dense 1-D (tile,) output block."""
    m, k = x_in.shape
    n_hid = w1_in.shape[1]
    in_bytes = _round_up(k, 128) * x_in.dtype.itemsize
    out_bytes = 4                                              # lane-dense f32 row
    # tile multiple of 512 keeps 1-D output blocks lane-aligned (unmasked vst) and
    # satisfies the bf16 (16,128) sublane rule for the x block.
    tile = _pick_tile(m, in_bytes, out_bytes, 512, vmem_budget_bytes)
    grid = (pl.cdiv(m, tile),)
    block_bytes = 2 * tile * (in_bytes + out_bytes)
    vmem_limit = int(min(48 << 20, max(20 << 20, block_bytes + (8 << 20))))
    y_flat = pl.pallas_call(
        _mlp_n1_kernel,
        out_shape=jax.ShapeDtypeStruct((m,), jnp.float32),
        grid=grid,
        in_specs=[
            pl.BlockSpec((tile, k), lambda i: (i, 0)),
            pl.BlockSpec((k, n_hid), lambda i: (0, 0)),
            pl.BlockSpec((1, n_hid), lambda i: (0, 0)),
            pl.BlockSpec((1, n_hid), lambda i: (0, 0)),
            pl.BlockSpec((1, 1), lambda i: (0, 0)),
        ],
        out_specs=pl.BlockSpec((tile,), lambda i: (i,)),
        compiler_params=pltpu.CompilerParams(
            dimension_semantics=("parallel",),
            vmem_limit_bytes=vmem_limit),
    )(x_in, w1_in, b1, w2_row, b2_scalar)
    return y_flat.reshape(m, 1)


def atomwise_forward(x, w1, b1, w2, b2, *, use_bf16_inputs=False,
                     vmem_budget_bytes=12 << 20):
    """Per-atom readout y = Dense2(shifted_softplus(Dense1(x))); x: [N, n_in]."""
    N, n_in = x.shape
    n_hidden = w1.shape[1]
    n_out = w2.shape[1]

    w1 = w1.astype(jnp.float32)
    w2 = w2.astype(jnp.float32)
    b1 = jnp.reshape(b1, (1, n_hidden)).astype(jnp.float32)
    # Fold the constant -log(2) of shifted_softplus through the linear layer 2:
    #   (softplus(z) - log2) @ w2 + b2 == softplus(z) @ w2 + (b2 - log2 * sum(w2, 0))
    b2_adj = (jnp.reshape(b2, (1, n_out)).astype(jnp.float32)
              - _LOG2 * jnp.sum(w2, axis=0, keepdims=True))

    # bf16 halves the dominant HBM stream (x) on every generation (v5e MXU is
    # bf16-native too); only a win if x already arrives in bf16 / the cast fuses.
    in_dtype = jnp.bfloat16 if use_bf16_inputs else jnp.float32
    x_in = x.astype(in_dtype)
    w1_in = w1.astype(in_dtype)

    # Pack `pack` atoms per 128-lane row: free row-major reshape of x plus
    # block-diagonal weights; densifies MXU / VPU / EUP work by `pack`x.
    pack = max(1, 128 // n_in)
    n_main = (N // pack) * pack
    m_rows = n_main // pack

    if pack > 1 and m_rows > 0:
        w1_pk = _block_diag(w1_in, pack)             # (pack*n_in, pack*n_hidden)
        b1_pk = jnp.tile(b1, (1, pack))              # (1, pack*n_hidden)
        w2_pk = _block_diag(w2, pack)                # (pack*n_hidden, pack*n_out)
        b2_pk = jnp.tile(b2_adj, (1, pack))          # (1, pack*n_out)
        x_pk = x_in[:n_main].reshape(m_rows, pack * n_in)
        y_pk = _run_mlp(x_pk, w1_pk, b1_pk, w2_pk, b2_pk,
                        vmem_budget_bytes=vmem_budget_bytes)
        y_main = y_pk.reshape(n_main, n_out)         # free unpack of the output
    elif m_rows > 0:
        if n_out == 1:
            y_main = _run_mlp_n1(x_in, w1_in, b1, w2.reshape(1, n_hidden),
                                 b2_adj.reshape(1, 1),
                                 vmem_budget_bytes=vmem_budget_bytes)
        else:
            # NOTE: lane width n_out << 128 -> masked output stores; cheap here since
            # the store slot is not the binding unit at these sizes, a transposed
            # (n_out, tile) output layout would remove them for very large heads.
            y_main = _run_mlp(x_in, w1_in, b1, w2, b2_adj,
                              vmem_budget_bytes=vmem_budget_bytes)
    else:
        y_main = jnp.zeros((0, n_out), jnp.float32)

    if n_main == N:
        return y_main

    # <= pack-1 leftover atoms: same math in plain JAX (negligible work; avoids a
    # full-array jnp.pad, which would add an extra HBM pass over x).
    x_t = x[n_main:].astype(in_dtype).astype(jnp.float32)
    w1_t = w1_in.astype(jnp.float32)
    y_tail = _softplus(x_t @ w1_t + b1) @ w2 + b2_adj
    return jnp.concatenate([y_main, y_tail.astype(jnp.float32)], axis=0)


def atomwise_reference(x, w1, b1, w2, b2):
    """Pure-JAX reference: Dense -> shifted_softplus -> Dense."""
    h = _softplus(jnp.dot(x, w1, precision=jax.lax.Precision.HIGHEST)
                  + b1.reshape(1, -1)) - _LOG2
    return jnp.dot(h, w2, precision=jax.lax.Precision.HIGHEST) + b2.reshape(1, -1)


if __name__ == "__main__":
    key = jax.random.PRNGKey(0)
    ks = jax.random.split(key, 8)

    # Module defaults: n_in=32, n_out=1, n_hidden=None, n_layers=2
    #   -> pyramidal layer sizes [32, 16, 1] with shifted_softplus.
    N_IN, N_HIDDEN, N_OUT = 32, 16, 1
    N_ATOMS = 2048                                   # -> 512 packed rows, 4 grid steps

    x = jax.random.normal(ks[0], (N_ATOMS, N_IN), dtype=jnp.float32)
    w1 = jax.random.normal(ks[1], (N_IN, N_HIDDEN), dtype=jnp.float32) / jnp.sqrt(N_IN)
    b1 = jax.random.normal(ks[2], (N_HIDDEN,), dtype=jnp.float32) * 0.01
    w2 = jax.random.normal(ks[3], (N_HIDDEN, N_OUT), dtype=jnp.float32) / jnp.sqrt(N_HIDDEN)
    b2 = jax.random.normal(ks[4], (N_OUT,), dtype=jnp.float32) * 0.01

    y_ref = atomwise_reference(x, w1, b1, w2, b2)

    # 1) main packed (4 atoms / 128-lane row) n_out=1 path, 4 pipelined grid steps
    y = jax.block_until_ready(atomwise_forward(x, w1, b1, w2, b2))
    assert y.shape == (N_ATOMS, N_OUT)
    assert jnp.allclose(y, y_ref, atol=2e-3, rtol=2e-3), "mismatch (packed n_out=1)"

    # 2) ragged atom count: JAX tail (3 atoms) + partial last Pallas block, no jnp.pad
    y_r = jax.block_until_ready(atomwise_forward(x[:1003], w1, b1, w2, b2))
    assert y_r.shape == (1003, N_OUT)
    assert jnp.allclose(y_r, y_ref[:1003], atol=2e-3, rtol=2e-3), "mismatch (ragged N)"

    # 3) n_out > 1 (rectangular readout head), still packed
    N_OUT_G = 4
    w2g = jax.random.normal(ks[5], (N_HIDDEN, N_OUT_G), dtype=jnp.float32) / jnp.sqrt(N_HIDDEN)
    b2g = jax.random.normal(ks[6], (N_OUT_G,), dtype=jnp.float32) * 0.01
    y_g = jax.block_until_ready(atomwise_forward(x[:300], w1, b1, w2g, b2g))
    assert y_g.shape == (300, N_OUT_G)
    assert jnp.allclose(y_g, atomwise_reference(x[:300], w1, b1, w2g, b2g),
                        atol=2e-3, rtol=2e-3), "mismatch (n_out>1 path)"

    # 4) opt-in bf16 x / w1 compression; reference sees the same rounded inputs
    y_b = jax.block_until_ready(
        atomwise_forward(x, w1, b1, w2, b2, use_bf16_inputs=True))
    x_r = x.astype(jnp.bfloat16).astype(jnp.float32)
    w1_r = w1.astype(jnp.bfloat16).astype(jnp.float32)
    assert jnp.allclose(y_b, atomwise_reference(x_r, w1_r, b1, w2, b2),
                        atol=5e-3, rtol=5e-3), "mismatch (bf16 path)"

    # 5) unpacked fallback (n_in too wide to pack): lane-dense 1-D output kernel
    N_IN_W, N_HID_W = 128, 64
    xw = jax.random.normal(ks[7], (700, N_IN_W), dtype=jnp.float32)
    w1w = jax.random.normal(ks[1], (N_IN_W, N_HID_W), dtype=jnp.float32) / jnp.sqrt(N_IN_W)
    b1w = jnp.zeros((N_HID_W,), jnp.float32)
    w2w = jax.random.normal(ks[3], (N_HID_W, 1), dtype=jnp.float32) / jnp.sqrt(N_HID_W)
    b2w = jnp.zeros((1,), jnp.float32)
    y_w = jax.block_until_ready(atomwise_forward(xw, w1w, b1w, w2w, b2w))
    assert y_w.shape == (700, 1)
    assert jnp.allclose(y_w, atomwise_reference(xw, w1w, b1w, w2w, b2w),
                        atol=2e-3, rtol=2e-3), "mismatch (unpacked n_out=1 path)"

    # Atomwise.forward() stores y back into the inputs dict under output_key /
    # per_atom_output_key (aggregation_mode is not applied inside forward()).
    outputs = {"scalar_representation": x, "y": y, "y_per_atom": y}
    del outputs

    print("KERNEL_OK")
</pallas_src>

<mosaic_0001>
module attributes {stable_mosaic.version = 11 : i64} {
  func.func @_mlp_kernel(%arg0: i32, %arg1: memref<128x128xf32, #tpu.memory_space<vmem>>, %arg2: memref<128x64xf32, #tpu.memory_space<vmem>>, %arg3: memref<1x64xf32, #tpu.memory_space<vmem>>, %arg4: memref<64x4xf32, #tpu.memory_space<vmem>>, %arg5: memref<1x4xf32, #tpu.memory_space<vmem>>, %arg6: memref<128x4xf32, #tpu.memory_space<vmem>>) attributes {dimension_semantics = [#tpu.dimension_semantics<parallel>], iteration_bounds = array<i64: 4>, scalar_prefetch = 0 : i64, scratch_operands = 0 : i64, tpu.core_type = #tpu.core_type<tc>, window_params = [{transform_indices = @transform_0, window_bounds = array<i64: 128, 128>}, {pipeline_mode = #tpu.pipeline_mode<synchronous>, transform_indices = @transform_1, window_bounds = array<i64: 128, 64>}, {pipeline_mode = #tpu.pipeline_mode<synchronous>, transform_indices = @transform_2, window_bounds = array<i64: 1, 64>}, {pipeline_mode = #tpu.pipeline_mode<synchronous>, transform_indices = @transform_3, window_bounds = array<i64: 64, 4>}, {pipeline_mode = #tpu.pipeline_mode<synchronous>, transform_indices = @transform_4, window_bounds = array<i64: 1, 4>}, {transform_indices = @transform_5, window_bounds = array<i64: 128, 4>}]} {
    %c0 = arith.constant 0 : index
    %c0_0 = arith.constant 0 : index
    %0 = vector.load %arg1[%c0, %c0_0] : memref<128x128xf32, #tpu.memory_space<vmem>>, vector<128x128xf32>
    %c0_1 = arith.constant 0 : index
    %c0_2 = arith.constant 0 : index
    %1 = vector.load %arg2[%c0_1, %c0_2] : memref<128x64xf32, #tpu.memory_space<vmem>>, vector<128x64xf32>
    %cst = arith.constant dense<0.000000e+00> : vector<128x64xf32>
    %2 = tpu.matmul %0, %1, %cst {dimension_numbers = #tpu.dot_dimension_numbers<[1], [0], [0], [1], [0, 0, 1, 1], [], []>} : vector<128x128xf32>, vector<128x64xf32>, vector<128x64xf32> -> vector<128x64xf32>
    %c0_3 = arith.constant 0 : index
    %c0_4 = arith.constant 0 : index
    %3 = vector.load %arg3[%c0_3, %c0_4] : memref<1x64xf32, #tpu.memory_space<vmem>>, vector<1x64xf32>
    %4 = vector.broadcast %3 : vector<1x64xf32> to vector<128x64xf32>
    %5 = arith.addf %2, %4 : vector<128x64xf32>
    %cst_5 = arith.constant 0.000000e+00 : f32
    %6 = vector.broadcast %cst_5 : f32 to vector<128x64xf32>
    %7 = arith.maximumf %5, %6 : vector<128x64xf32>
    %8 = math.absf %5 : vector<128x64xf32>
    %cst_6 = arith.constant 0.000000e+00 : f32
    %9 = vector.broadcast %cst_6 : f32 to vector<128x64xf32>
    %10 = arith.subf %9, %8 : vector<128x64xf32>
    %11 = math.exp %10 : vector<128x64xf32>
    %12 = math.log1p %11 : vector<128x64xf32>
    %13 = arith.addf %7, %12 : vector<128x64xf32>
    %c0_7 = arith.constant 0 : index
    %c0_8 = arith.constant 0 : index
    %14 = vector.load %arg4[%c0_7, %c0_8] : memref<64x4xf32, #tpu.memory_space<vmem>>, vector<64x4xf32>
    %cst_9 = arith.constant dense<0.000000e+00> : vector<128x4xf32>
    %15 = tpu.matmul %13, %14, %cst_9 {dimension_numbers = #tpu.dot_dimension_numbers<[1], [0], [0], [1], [0, 0, 1, 1], [], []>} : vector<128x64xf32>, vector<64x4xf32>, vector<128x4xf32> -> vector<128x4xf32>
    %c0_10 = arith.constant 0 : index
    %c0_11 = arith.constant 0 : index
    %16 = vector.load %arg5[%c0_10, %c0_11] : memref<1x4xf32, #tpu.memory_space<vmem>>, vector<1x4xf32>
    %17 = vector.broadcast %16 : vector<1x4xf32> to vector<128x4xf32>
    %18 = arith.addf %15, %17 : vector<128x4xf32>
    %c0_12 = arith.constant 0 : index
    %c0_13 = arith.constant 0 : index
    %19 = vector.load %arg6[%c0_12, %c0_13] : memref<128x4xf32, #tpu.memory_space<vmem>>, vector<128x4xf32>
    tpu.vector_store %arg6[%c0_12, %c0_13], %18 {strides = array<i32>} : memref<128x4xf32, #tpu.memory_space<vmem>>, vector<128x4xf32>,
    return
  }
  func.func @transform_0(%arg0: i32) -> (i32, i32) {
    %c0_i32 = arith.constant 0 : i32
    %c0_i32_0 = arith.constant 0 : i32
    return %arg0, %c0_i32 : i32, i32
  }
  func.func @transform_1(%arg0: i32) -> (i32, i32) {
    %c0_i32 = arith.constant 0 : i32
    %c0_i32_0 = arith.constant 0 : i32
    %c0_i32_1 = arith.constant 0 : i32
    return %c0_i32, %c0_i32_0 : i32, i32
  }
  func.func @transform_2(%arg0: i32) -> (i32, i32) {
    %c0_i32 = arith.constant 0 : i32
    %c0_i32_0 = arith.constant 0 : i32
    %c0_i32_1 = arith.constant 0 : i32
    return %c0_i32, %c0_i32_0 : i32, i32
  }
  func.func @transform_3(%arg0: i32) -> (i32, i32) {
    %c0_i32 = arith.constant 0 : i32
    %c0_i32_0 = arith.constant 0 : i32
    %c0_i32_1 = arith.constant 0 : i32
    return %c0_i32, %c0_i32_0 : i32, i32
  }
  func.func @transform_4(%arg0: i32) -> (i32, i32) {
    %c0_i32 = arith.constant 0 : i32
    %c0_i32_0 = arith.constant 0 : i32
    %c0_i32_1 = arith.constant 0 : i32
    return %c0_i32, %c0_i32_0 : i32, i32
  }
  func.func @transform_5(%arg0: i32) -> (i32, i32) {
    %c0_i32 = arith.constant 0 : i32
    %c0_i32_0 = arith.constant 0 : i32
    return %arg0, %c0_i32 : i32, i32
  }
}

</mosaic_0001>

<bundles_post_ra>
// kernel: tpu_custom_call.1
= control target key start
LH: loop header
LB: loop body
LE: loop exit
PB: predicated region body
PF: predicated region fallthrough
CT: control target
= control target key end

     0   :  { %10 = vsyncpa [#allocation3], 0  ;;  %s1925_s0 = inlined_call_operand.hbm [shape: f32[512,128], index: 0, kind: input, shape index: {}]   ;;  %s1926_s1 = inlined_call_operand.vmem [shape: f32[128,64], index: 1, kind: input, shape index: {}]   ;;  %s1927_s2 = inlined_call_operand.vmem [shape: f32[1,64], index: 2, kind: input, shape index: {}]   ;;  %s1928_s3 = inlined_call_operand.vmem [shape: f32[64,4], index: 3, kind: input, shape index: {}]   ;;  %s1929_s4 = inlined_call_operand.vmem [shape: f32[1,4], index: 4, kind: input, shape index: {}]   ;;  %s1930_s5 = inlined_call_operand.vmem [shape: f32[512,4], index: 5, kind: output, shape index: {}]  }
   0x1   :  { %12 = vsyncpa [#allocation3 + $0x1], 0  ;;  %s1400_s18 = smov 0   ;;  %s1402_s19 = smov 0  }
   0x2   :  { %s1404_s20 = smov 0   ;;  %s1406_s21 = smov 0  }
   0x3 LB: > { %s964_s22 = sadd.s32 4294967295, %s1365_s21   ;;  %s1420_s23 = sadd.s32 1, %s1365_s21   ;;  %s1365_s21 = sphi %s1406_s21, %s1961_s21   ;;  %s1361_s20 = sphi %s1404_s20, %s1960_s20   ;;  %s1357_s19 = sphi %s1402_s19, %s1959_s19   ;;  %s1353_s18 = sphi %s1400_s18, %s1958_s18  }
   0x4   : > { %s22_s24 = ssub.s32 %s1365_s21, %s1420_s23  ;;  %s25_s25 = sadd.s32 1, %s1361_s20 }
   0x5   : > { %p23_p0 = scmp.eq.s32.totalorder %s22_s24, 0  ;;  %p32_p1 = scmp.ne.s32.totalorder %s1361_s20, %s1357_s19 }
   0x6   : > { %p33_p2 = scmp.eq.s32.totalorder %s1365_s21, 0  ;;  %p38_p3 = scmp.ne.s32.totalorder %s1357_s19, %s1353_s18 }
   0x7   : > { %s1430_s26 = scalar_select %p23_p0, %s1361_s20, %s25_s25  }
   0x8   : > { %p34_p4 = por %p33_p2, %p32_p1  ;;  %p39_p5 = scmp.eq.s32.totalorder %s964_s22, 0 }
   0x9   : > { %p1202_p6 = scmp.lt.s32.totalorder %s1365_s21, 4  ;;  %s184_s28 = sand.u32 1, %s1361_s20  }
   0xa   : > { %p1435_p7 = por %p39_p5, %p38_p3  ;;  %s968_s29 = sshll.u32 %s184_s28, 7 }
   0xb   : > { %s995_s30 = sshll.u32 %s1365_s21, 11  ;;  %s188_s9 = scalar_lea.vmem [#allocation2], %s968_s29 }
   0xc   : > { %s1444_s8 = scalar_lea.hbm %s1925_s0, %s995_s30  ;;  %s195_s10 = sshll.u32 %s188_s9, 4  ;;  %s1446_s10 = int_to_ptr.vmem [resolvable:$true] %s195_s10 }
   0xd   : > { %p1448_p8 = pnand %p1202_p6, %p34_p4  ;;  %s1453_s12 = scalar_lea.sflag [#allocation3], %s184_s28 }
   0xe   : > { %s1301_s13 = scalar_lea.hbm %s1444_s8, 2048  ;;  %s1306_s16 = scalar_lea.hbm %s1925_s0, 8192 }
   0xf   : > { %p1302_p10 = scmp.ne.s32.totalorder %s1444_s8, %s1301_s13  ;;  %p1303_p11 = pneg %p1448_p8 }
  0x10   : > { %p1307_p0 = scmp.lt.u32.totalorder %s1444_s8, %s1925_s0  ;;  %p1308_p1 = scmp.lt.u32.totalorder %s1306_s16, %s1301_s13 }
  0x11   : > { %p1304_p12 = pnand %p1303_p11, %p1302_p10  ;;  %p1310_p3 = scmp.lt.u32.totalorder %s1301_s13, %s1444_s8 }
  0x12   : > { %p1309_p2 = por %p1308_p1, %p1307_p0 }
  0x13   : > { %p1305_p13 = pneg %p1304_p12 }
  0x14   : > { %p1311_p4 = por %p1310_p3, %p1309_p2 }
  0x16   : > { %p1312_p5 = pnand %p1311_p4, %p1305_p13 }
  0x18   : > { %1315 = shalt.err (!%p1312_p5)
}
  0x19   : > { %s1316_s24 = scalar_lea.vmem %s1446_s10, 2048  ;;  %s1367_s25 = smov [#allocation2]  }
  0x1a   : > { %p1317_p6 = scmp.ne.s32.totalorder %s1446_s10, %s1316_s24  ;;  %s1321_s28 = sshll.u32 %s1367_s25, 4  ;;  %s1322_s28 = int_to_ptr.vmem [resolvable:$false] %s1321_s28 }
  0x1b   : > { %s1323_s29 = scalar_lea.vmem %s1322_s28, 4096  ;;  %p1324_p9 = scmp.lt.s32.totalorder %s1446_s10, %s1322_s28 }
  0x1c   : > { %p1319_p10 = pnand %p1317_p6, %p1303_p11  ;;  %p1325_p0 = scmp.lt.s32.totalorder %s1323_s29, %s1316_s24 }
  0x1e   : > { %p1320_p12 = pneg %p1319_p10  ;;  %p1326_p1 = por %p1325_p0, %p1324_p9 }
  0x20   : > { %p1327_p2 = pnand %p1326_p1, %p1320_p12 }
  0x22   : > { %1330 = shalt.err (!%p1327_p2)
}
  0x23   : > { %s1368_s30 = smov 128   ;;  %s1369_s6 = smov 8  }
  0x24   : > { %1201 = dma.hbm_to_vmem [thread:$0]  (!%p1448_p8), %s1444_s8, 2048, %s1446_s10, %s1453_s12, %s1368_s30, %s1368_s30, %s1369_s6  }
  0x25   : > { %p203_p11 = scmp.lt.s32.totalorder %s1365_s21, 5  ;;  %p1933_p13 = scmp.ge.s32.totalorder %s1365_s21, 1 }
  0x27   : > { %p204_p3 = pnand %p1933_p13, %p203_p11 }
  0x28   : > { %s209_s7 = sand.u32 (!%p204_p3), 1, %s1357_s19  }
  0x29   : > { %207 = sbr.rel (%p204_p3) target bundleno = 592 (0x250), region = 40  ;;  %s972_s9 = sshll.u32 (!%p204_p3), %s209_s7, 7 }
  0x2a   : > { %s210_s13 = scalar_lea.sflag (!%p204_p3), [#allocation3], %s209_s7  ;;  %s1485_s14 = scalar_lea.vmem (!%p204_p3), [#allocation2], %s972_s9 }
  0x30   : > { %1348 = dma.done.wait (%p1435_p7), %s210_s13, 2048  }
  0x31   : > { %1350 = vsyncadd (%p1435_p7), %s210_s13, 4294965248  ;;  %v263_v0 = vld [vmem:[%s1926_s1] sm:$0xff]  ;;  %v264_v1 = vld [vmem:[%s1926_s1 + $0x8] sm:$0xff]  ;;  %vm686_vm3 = vcmask 523264   ;;  %s973_s30 = sshll.u32 %s964_s22, 4 }
  0x32   : > { %v265_v2 = vld [vmem:[%s1926_s1 + $0x10] sm:$0xff]  ;;  %v1148_v3 = vpack.c.bf16 %v264_v1, %v263_v0  ;;  %v266_v4 = vld [vmem:[%s1926_s1 + $0x18] sm:$0xff]  ;;  %v267_v6 = vld [vmem:[%s1926_s1 + $0x20] sm:$0xff]  ;;  %p242_p7 = scmp.lt.s32.totalorder %s973_s30, 63 }
  0x33   : > { %v1152_v5 = vpack.c.bf16 %v266_v4, %v265_v2  ;;  %v268_v7 = vld [vmem:[%s1926_s1 + $0x28] sm:$0xff]  ;;  %v247_v9 = vld [vmem:[%s1485_s14] sm:$0xff]  ;;  %v269_v10 = vld [vmem:[%s1926_s1 + $0x30] sm:$0xff] }
  0x34   : > { %1149 = vmatprep.subr.bf16.mxu0 %v1148_v3  ;;  %v1156_v8 = vpack.c.bf16 %v268_v7, %v267_v6  ;;  %v270_v11 = vld [vmem:[%s1926_s1 + $0x38] sm:$0xff]  ;;  %1084 = vmatprep.mubr.f32.mxu0 %v247_v9  ;;  %v271_v13 = vld [vmem:[%s1926_s1 + $0x40] sm:$0xff]  ;;  %v272_v14 = vld [vmem:[%s1926_s1 + $0x48] sm:$0xff]  ;;  %s1963_s30 = smov (!%p242_p7, %s973_s30), 63 }
  0x35   : > { %1151 = vmatpush3.bf16.msra.mxu0 %v1148_v3  ;;  %v1160_v12 = vpack.c.bf16 %v270_v11, %v269_v10  ;;  %v1164_v15 = vpack.c.bf16 %v272_v14, %v271_v13  ;;  %v273_v16 = vld [vmem:[%s1926_s1 + $0x50] sm:$0xff]  ;;  %v274_v17 = vld [vmem:[%s1926_s1 + $0x58] sm:$0xff]  ;;  %v275_v19 = vld [vmem:[%s1926_s1 + $0x60] sm:$0xff]  ;;  %s974_s6 = sshll.u32 %s1963_s30, 3 }
  0x36   : > { %1153 = vmatprep.subr.bf16.mxu0 %v1152_v5  ;;  %v1168_v18 = vpack.c.bf16 %v274_v17, %v273_v16  ;;  %v276_v20 = vld [vmem:[%s1926_s1 + $0x68] sm:$0xff]  ;;  %v277_v22 = vld [vmem:[%s1926_s1 + $0x70] sm:$0xff]  ;;  %v278_v23 = vld [vmem:[%s1926_s1 + $0x78] sm:$0xff]  ;;  %s1878_s16 = scalar_lea.vmem %s1930_s5, %s974_s6 }
  0x37   : > { %v1172_v21 = vpack.c.bf16 %v276_v20, %v275_v19  ;;  %v1176_v24 = vpack.c.bf16 %v278_v23, %v277_v22  ;;  %v248_v25 = vld [vmem:[%s1485_s14 + $0x8] sm:$0xff]  ;;  %v249_v26 = vld [vmem:[%s1485_s14 + $0x10] sm:$0xff]  ;;  %v250_v27 = vld [vmem:[%s1485_s14 + $0x18] sm:$0xff] }
  0x38   : > { %v251_v28 = vld [vmem:[%s1485_s14 + $0x20] sm:$0xff]  ;;  %v252_v29 = vld [vmem:[%s1485_s14 + $0x28] sm:$0xff]  ;;  %v253_v30 = vld [vmem:[%s1485_s14 + $0x30] sm:$0xff] }
  0x39   : > { %1155 = vmatpush3.bf16.msra.mxu0 %v1152_v5  ;;  %v254_v31 = vld [vmem:[%s1485_s14 + $0x38] sm:$0xff]  ;;  %v255_v32 = vld [vmem:[%s1485_s14 + $0x40] sm:$0xff]  ;;  %v256_v33 = vld [vmem:[%s1485_s14 + $0x48] sm:$0xff] }
  0x3a   : > { %1157 = vmatprep.subr.bf16.mxu0 %v1156_v8  ;;  %v257_v34 = vld [vmem:[%s1485_s14 + $0x50] sm:$0xff]  ;;  %v258_v35 = vld [vmem:[%s1485_s14 + $0x58] sm:$0xff]  ;;  %v259_v36 = vld [vmem:[%s1485_s14 + $0x60] sm:$0xff] }
  0x3b   : > { %v260_v37 = vld [vmem:[%s1485_s14 + $0x68] sm:$0xff]  ;;  %v261_v38 = vld [vmem:[%s1485_s14 + $0x70] sm:$0xff]  ;;  %v262_v39 = vld [vmem:[%s1485_s14 + $0x78] sm:$0xff] }
  0x3c   : > { %v671_v40 = vld [vmem:[%s1928_s3] sm:$0xff]  ;;  %v672_v41 = vld [vmem:[%s1928_s3 + $0x8] sm:$0xff]  ;;  %v673_v43 = vld [vmem:[%s1928_s3 + $0x10] sm:$0xff] }
  0x3d   : > { %1159 = vmatpush3.bf16.msra.mxu0 %v1156_v8  ;;  %v1180_v42 = vpack.c.bf16 %v672_v41, %v671_v40  ;;  %v674_v44 = vld [vmem:[%s1928_s3 + $0x18] sm:$0xff]  ;;  %v675_v46 = vld [vmem:[%s1928_s3 + $0x20] sm:$0xff]  ;;  %v676_v47 = vld [vmem:[%s1928_s3 + $0x28] sm:$0xff] }
  0x3e   : > { %1161 = vmatprep.subr.bf16.mxu0 %v1160_v12  ;;  %v1184_v45 = vpack.c.bf16 %v674_v44, %v673_v43  ;;  %v1188_v48 = vpack.c.bf16 %v676_v47, %v675_v46  ;;  %v677_v49 = vld [vmem:[%s1928_s3 + $0x30] sm:$0xff]  ;;  %v678_v50 = vld [vmem:[%s1928_s3 + $0x38] sm:$0xff]  ;;  %v1582_v58 = vld [vmem:[%s1927_s2] ss:$0 sm:$0xff] }
  0x3f   : > { %1181 = vmatprep.subr.bf16.mxu1 %v1180_v42  ;;  %v1192_v51 = vpack.c.bf16 %v678_v50, %v677_v49 }
  0x40   : > { %1183 = vmatpush3.bf16.msra.mxu1 %v1180_v42 }
  0x41   : > { %1163 = vmatpush3.bf16.msra.mxu0 %v1160_v12  ;;  %1185 = vmatprep.subr.bf16.mxu1 %v1184_v45 }
  0x42   : > { %1165 = vmatprep.subr.bf16.mxu0 %v1164_v15 }
  0x44   : > { %1187 = vmatpush3.bf16.msra.mxu1 %v1184_v45 }
  0x45   : > { %1167 = vmatpush3.bf16.msra.mxu0 %v1164_v15  ;;  %1189 = vmatprep.subr.bf16.mxu1 %v1188_v48 }
  0x46   : > { %1169 = vmatprep.subr.bf16.mxu0 %v1168_v18 }
  0x48   : > { %1191 = vmatpush3.bf16.msra.mxu1 %v1188_v48 }
  0x49   : > { %1171 = vmatpush3.bf16.msra.mxu0 %v1168_v18  ;;  %1193 = vmatprep.subr.bf16.mxu1 %v1192_v51 }
  0x4a   : > { %1173 = vmatprep.subr.bf16.mxu0 %v1172_v21 }
  0x4c   : > { %1195 = vmatpush3.bf16.msra.mxu1 %v1192_v51 }
  0x4d   : > { %1175 = vmatpush3.bf16.msra.mxu0 %v1172_v21 }
  0x4e   : > { %1177 = vmatprep.subr.bf16.mxu0 %v1176_v24 }
  0x51   : > { %1179 = vmatpush3.bf16.msra.mxu0 %v1176_v24 }
  0x54   : > { %1085 = vmatmul.mubr.f32.vlgmr.msra.gmra.mrb[0].mxu0 %v248_v25 }
  0x55   : > { %1087 = vmatprep.mubr.f32.mxu0 %v249_v26 }
  0x58   : > { %1088 = vmatmul.mubr.f32.gmra.mrb[2].mxu0 %v250_v27 }
  0x59   : > { %1090 = vmatprep.mubr.f32.mxu0 %v251_v28 }
  0x5c   : > { %1091 = vmatmul.mubr.f32.gmra.mrb[4].mxu0 %v252_v29 }
  0x5d   : > { %1093 = vmatprep.mubr.f32.mxu0 %v253_v30 }
  0x60   : > { %1094 = vmatmul.mubr.f32.gmra.mrb[6].mxu0 %v254_v31 }
  0x61   : > { %1096 = vmatprep.mubr.f32.mxu0 %v255_v32 }
  0x64   : > { %1097 = vmatmul.mubr.f32.gmra.mrb[8].mxu0 %v256_v33 }
  0x65   : > { %1099 = vmatprep.mubr.f32.mxu0 %v257_v34 }
  0x68   : > { %1100 = vmatmul.mubr.f32.gmra.mrb[10].mxu0 %v258_v35 }
  0x69   : > { %1102 = vmatprep.mubr.f32.mxu0 %v259_v36 }
  0x6c   : > { %1103 = vmatmul.mubr.f32.gmra.mrb[12].mxu0 %v260_v37 }
  0x6d   : > { %1105 = vmatprep.mubr.f32.mxu0 %v261_v38 }
  0x70   : > { %1106 = vmatmul.mubr.f32.gmra.mrb[14].mxu0 %v262_v39 }
 0x127   : > { %v1086_v52 = vpop.f32.mrb[0].mxu0 }
 0x128   : > { %v352_v53 = vpop.f32.mrb[1].mxu0  ;;  %v1585_v61 = vadd.f32 %v1086_v52, %v1582_v58 }
 0x129   : > { %v1604_v13 = vadd.f32 %v1582_v58, %v352_v53 }
 0x12a   : > { %v448_v1 = vand.u32 2147483647, %v1585_v61 }
 0x12b   : > { %v1089_v54 = vpop.f32.mrb[2].mxu0  ;;  %v447_v23 = vand.u32 2147483647, %v1604_v13 }
 0x12c   : > { %v362_v55 = vpop.f32.mrb[3].mxu0  ;;  %v1592_v2 = vadd.f32 %v1089_v54, %v1582_v58  ;;  %v464_v7 = vsub.f32 0.0, %v448_v1 }
 0x12d   : > { %v1588_v62 = vadd.f32 %v1582_v58, %v362_v55  ;;  %v463_v32 = vsub.f32 0.0, %v447_v23 }
 0x12e   : > { %v450_v8 = vand.u32 2147483647, %v1592_v2  ;;  %v481_v15 = vmul.f32 1.442695, %v464_v7 }
 0x12f   : > { %v1092_v56 = vpop.f32.mrb[4].mxu0  ;;  %v449_v3 = vand.u32 2147483647, %v1588_v62  ;;  %v479_v39 = vmul.f32 1.442695, %v463_v32 }
 0x130   : > { %v372_v57 = vpop.f32.mrb[5].mxu0  ;;  %v466_v16 = vsub.f32 0.0, %v450_v8  ;;  %v1607_v17 = vadd.f32 %v1092_v56, %v1582_v58  ;;  %1237 = vpow2.f32 %v481_v15  ;;  %v432_v56 = vmax.f32 %v1585_v61, 0.0 }
 0x131   : > { %v1596_v4 = vadd.f32 %v1582_v58, %v372_v57  ;;  %v465_v9 = vsub.f32 0.0, %v449_v3 }
 0x132   : > { %v485_v26 = vmul.f32 1.442695, %v466_v16  ;;  %v452_v27 = vand.u32 2147483647, %v1607_v17  ;;  %v436_v16 = vmax.f32 %v1607_v17, 0.0 }
 0x133   : > { %v1095_v59 = vpop.f32.mrb[6].mxu0  ;;  %v451_v10 = vand.u32 2147483647, %v1596_v4  ;;  %v483_v18 = vmul.f32 1.442695, %v465_v9  ;;  %v433_v9 = vmax.f32 %v1588_v62, 0.0 }
 0x134   : > { %v382_v60 = vpop.f32.mrb[7].mxu0  ;;  %v1610_v20 = vadd.f32 %v1095_v59, %v1582_v58  ;;  %v468_v35 = vsub.f32 0.0, %v452_v27 }
 0x135   : > { %v1601_v11 = vadd.f32 %v1582_v58, %v382_v60  ;;  %v467_v19 = vsub.f32 0.0, %v451_v10  ;;  %1239 = vpow2.f32 %v483_v18  ;;  %v431_v60 = vmax.f32 %v1604_v13, 0.0 }
 0x136   : > { %v454_v30 = vand.u32 2147483647, %v1610_v20  ;;  %1241 = vpow2.f32 %v485_v26  ;;  %v489_v42 = vmul.f32 1.442695, %v468_v35  ;;  %v435_v18 = vmax.f32 %v1596_v4, 0.0 }
 0x137   : > { %v1098_v63 = vpop.f32.mrb[8].mxu0  ;;  %v453_v21 = vand.u32 2147483647, %v1601_v11  ;;  %v487_v29 = vmul.f32 1.442695, %v467_v19 }
 0x138   : > { %v392_v0 = vpop.f32.mrb[9].mxu0  ;;  %v1619_v28 = vadd.f32 %v1098_v63, %v1582_v58  ;;  %v470_v37 = vsub.f32 0.0, %v454_v30  ;;  %v434_v63 = vmax.f32 %v1592_v2, 0.0 }
 0x139   : > { %v1615_v24 = vadd.f32 %v1582_v58, %v392_v0  ;;  %v469_v31 = vsub.f32 0.0, %v453_v21  ;;  %1243 = vpow2.f32 %v487_v29 }
 0x13a   : > { %v456_v36 = vand.u32 2147483647, %v1619_v28  ;;  %v493_v45 = vmul.f32 1.442695, %v470_v37  ;;  %v1631_v46 = vpop.eup %1237 }
 0x13b   : > { %v1101_v5 = vpop.f32.mrb[10].mxu0  ;;  %v455_v33 = vand.u32 2147483647, %v1615_v24  ;;  %v491_v38 = vmul.f32 1.442695, %v469_v31  ;;  %v520_v54 = vadd.f32 1.0, %v1631_v46 }
 0x13c   : > { %v402_v6 = vpop.f32.mrb[11].mxu0  ;;  %v472_v43 = vsub.f32 0.0, %v456_v36  ;;  %v1629_v44 = vadd.f32 %v1101_v5, %v1582_v58  ;;  %v523_v7 = vmul.f32 -0.5, %v1631_v46  ;;  %v526_v27 = vand.u32 2147483647, %v1631_v46 }
 0x13d   : > { %v1624_v34 = vadd.f32 %v1582_v58, %v402_v6  ;;  %v471_v40 = vsub.f32 0.0, %v455_v33  ;;  %1245 = vpow2.f32 %v491_v38 }
 0x13e   : > { %1247 = vpow2.f32 %v479_v39  ;;  %v497_v51 = vmul.f32 1.442695, %v472_v43  ;;  %v458_v52 = vand.u32 2147483647, %v1629_v44  ;;  %v524_v30 = vadd.f32 1.0, %v523_v7 }
 0x13f   : > { %v1104_v12 = vpop.f32.mrb[12].mxu0  ;;  %v457_v41 = vand.u32 2147483647, %v1624_v34  ;;  %v495_v47 = vmul.f32 1.442695, %v471_v40  ;;  %v1633_v48 = vpop.eup %1239  ;;  %1249 = vpow2.f32 %v489_v42 }
 0x140   : > { %v412_v14 = vpop.f32.mrb[13].mxu0  ;;  %v1636_v50 = vadd.f32 %v1104_v12, %v1582_v58  ;;  %1251 = vpow2.f32 %v493_v45  ;;  %v1643_v55 = vpop.eup %1241  ;;  %v529_v57 = vadd.f32 1.0, %v1633_v48  ;;  %v474_v3 = vsub.f32 0.0, %v458_v52 }
 0x141   : > { %v473_v49 = vsub.f32 0.0, %v457_v41  ;;  %v1640_v53 = vadd.f32 %v1582_v58, %v412_v14  ;;  %1253 = vpow2.f32 %v495_v47  ;;  %v538_v8 = vadd.f32 1.0, %v1643_v55 }
 0x142   : > { %v460_v1 = vand.u32 2147483647, %v1636_v50  ;;  %1255 = vpow2.f32 %v497_v51  ;;  %v541_v35 = vmul.f32 -0.5, %v1643_v55  ;;  %v544_v39 = vand.u32 2147483647, %v1643_v55 }
 0x143   : > { %v1107_v22 = vpop.f32.mrb[14].mxu0  ;;  %v1647_v59 = vpop.eup %1243  ;;  %v499_v0 = vmul.f32 1.442695, %v473_v49  ;;  %v459_v5 = vand.u32 2147483647, %v1640_v53  ;;  %1257 = vlog2.f32 %v520_v54  ;;  %v532_v42 = vmul.f32 -0.5, %v1633_v48 }
 0x144   : > { %v422_v25 = vpop.f32.mrb[15].mxu0  ;;  %v1654_v6 = vadd.f32 %v1107_v22, %v1582_v58  ;;  %1259 = vlog2.f32 %v529_v57  ;;  %v547_v10 = vadd.f32 1.0, %v1647_v59  ;;  %v476_v19 = vsub.f32 0.0, %v460_v1 }
 0x145   : > { %v475_v12 = vsub.f32 0.0, %v459_v5  ;;  %v1661_v14 = vadd.f32 %v1582_v58, %v422_v25  ;;  %1261 = vpow2.f32 %v499_v0  ;;  %v501_v22 = vmul.f32 1.442695, %v474_v3 }
 0x146   : > { %v462_v26 = vand.u32 2147483647, %v1654_v6  ;;  %1263 = vlog2.f32 %v538_v8  ;;  %v438_v58 = vmax.f32 %v1610_v20, 0.0  ;;  %v437_v25 = vmax.f32 %v1601_v11, 0.0 }
 0x147   : > { %v1663_v15 = vpop.eup %1245  ;;  %v503_v23 = vmul.f32 1.442695, %v475_v12  ;;  %1265 = vlog2.f32 %v547_v10  ;;  %v461_v32 = vand.u32 2147483647, %v1661_v14  ;;  %v505_v36 = vmul.f32 1.442695, %v476_v19 }
 0x148   : > { %v1667_v21 = vpop.eup %1247  ;;  %v565_v31 = vadd.f32 1.0, %v1663_v15  ;;  %v478_v40 = vsub.f32 0.0, %v462_v26  ;;  %v535_v43 = vand.u32 2147483647, %v1633_v48  ;;  %v542_v57 = vadd.f32 1.0, %v541_v35 }
 0x149   : > { %v1673_v29 = vpop.eup %1249  ;;  %1267 = vpow2.f32 %v503_v23  ;;  %v511_v37 = vadd.f32 1.0, %v1667_v21  ;;  %v477_v41 = vsub.f32 0.0, %v461_v32  ;;  %v550_v0 = vmul.f32 -0.5, %v1647_v59 }
 0x14a   : > { %v1677_v33 = vpop.eup %1251  ;;  %1269 = vpow2.f32 %v501_v22  ;;  %v556_v45 = vadd.f32 1.0, %v1673_v29  ;;  %v559_v49 = vmul.f32 -0.5, %v1673_v29  ;;  %v525_v5 = vmul.f32 %v1631_v46, %v524_v30 }
 0x14b   : > { %v1681_v38 = vpop.eup %1253  ;;  %1271 = vlog2.f32 %v511_v37  ;;  %v574_v51 = vadd.f32 1.0, %v1677_v33  ;;  %v507_v52 = vmul.f32 1.442695, %v477_v41  ;;  %vm1694_vm0 = vcmp.lt.f32.partialorder %v526_v27, 0.0004427343 }
 0x14c   : > { %v1687_v47 = vpop.eup %1255  ;;  %1273 = vlog2.f32 %v565_v31  ;;  %v583_v1 = vadd.f32 1.0, %v1681_v38  ;;  %v509_v8 = vmul.f32 1.442695, %v478_v40  ;;  %v533_v12 = vadd.f32 1.0, %v532_v42 }
 0x14d   : > { %v1258_v54 = vpop.eup %1257  ;;  %1275 = vpow2.f32 %v505_v36  ;;  %v592_v19 = vadd.f32 1.0, %v1687_v47  ;;  %v514_v22 = vmul.f32 -0.5, %v1667_v21  ;;  %vm1702_vm1 = vcmp.lt.f32.partialorder %v544_v39, 0.0004427343 }
 0x14e   : > { %v1260_v3 = vpop.eup %1259  ;;  %1277 = vpow2.f32 %v507_v52  ;;  %vm1706_vm2 = vcmp.lt.f32.partialorder %v535_v43, 0.0004427343  ;;  %v560_v26 = vadd.f32 1.0, %v559_v49  ;;  %v553_v27 = vand.u32 2147483647, %v1647_v59 }
 0x14f   : > { %v1698_v10 = vpop.eup %1261  ;;  %1279 = vlog2.f32 %v556_v45  ;;  %v522_v31 = vmul.f32 0.6931472, %v1258_v54  ;;  %v1712_v32 = vmul.f32 %v1643_v55, %v542_v57  ;;  %v551_v35 = vadd.f32 1.0, %v550_v0 }
 0x150   : > { %1281 = vlog2.f32 %v574_v51  ;;  %v1264_v30 = vpop.eup %1263  ;;  %v531_v37 = vmul.f32 0.6931472, %v1260_v3  ;;  %v577_v39 = vmul.f32 -0.5, %v1677_v33  ;;  %v601_v40 = vadd.f32 1.0, %v1698_v10 }
 0x151   : > { %1283 = vlog2.f32 %v583_v1  ;;  %v1266_v36 = vpop.eup %1265  ;;  %v534_v42 = vmul.f32 %v1633_v48, %v533_v12  ;;  %v562_v43 = vand.u32 2147483647, %v1673_v29  ;;  %v515_v45 = vadd.f32 1.0, %v514_v22 }
 0x152   : > { %1285 = vpow2.f32 %v509_v8  ;;  %v1723_v49 = vmul.f32 %v1673_v29, %v560_v26  ;;  %vm1725_vm4 = vcmp.lt.f32.partialorder %v553_v27, 0.0004427343  ;;  %v568_v52 = vmul.f32 -0.5, %v1663_v15 }
 0x153   : > { %v1716_v41 = vpop.eup %1267  ;;  %1287 = vlog2.f32 %v592_v19  ;;  %v517_v54 = vand.u32 2147483647, %v1667_v21  ;;  %v528_v48 = vsel %vm1694_vm0, %v525_v5, %v522_v31  ;;  %v540_v0 = vmul.f32 0.6931472, %v1264_v30 }
 0x154   : > { %v1720_v55 = vpop.eup %1269  ;;  %v552_v1 = vmul.f32 %v1647_v59, %v551_v35  ;;  %v580_v3 = vand.u32 2147483647, %v1677_v33  ;;  %v537_v29 = vsel %vm1706_vm2, %v534_v42, %v531_v37  ;;  %v578_v12 = vadd.f32 1.0, %v577_v39 }
 0x155   : > { %v1272_v57 = vpop.eup %1271  ;;  %1289 = vlog2.f32 %v601_v40  ;;  %v619_v19 = vadd.f32 1.0, %v1716_v41  ;;  %vm1740_vm5 = vcmp.lt.f32.partialorder %v562_v43, 0.0004427343  ;;  %v549_v5 = vmul.f32 0.6931472, %v1266_v36 }
 0x156   : > { %v1274_v8 = vpop.eup %1273  ;;  %v610_v7 = vadd.f32 1.0, %v1720_v55  ;;  %v513_v59 = vmul.f32 0.6931472, %v1272_v57  ;;  %v516_v27 = vmul.f32 %v1667_v21, %v515_v45  ;;  %v656_v46 = vadd.f32 %v528_v48, %v432_v56 }
 0x157   : > { %v1738_v22 = vpop.eup %1275  ;;  %v569_v31 = vadd.f32 1.0, %v568_v52  ;;  %v571_v35 = vand.u32 2147483647, %v1663_v15  ;;  %vm518_vm6 = vcmp.lt.f32.partialorder %v517_v54, 0.0004427343  ;;  %v546_v39 = vsel %vm1702_vm1, %v1712_v32, %v540_v0 }
 0x158   : > { %v1746_v30 = vpop.eup %1277  ;;  %v595_v36 = vmul.f32 -0.5, %v1687_v47  ;;  %v586_v40 = vmul.f32 -0.5, %v1681_v38  ;;  %v519_v42 = vsel %vm518_vm6, %v516_v27, %v513_v59  ;;  %v657_v43 = vadd.f32 %v537_v29, %v433_v9 }
 0x159   : > { %v1280_v37 = vpop.eup %1279  ;;  %1291 = vlog2.f32 %v619_v19  ;;  %v637_v61 = vadd.f32 1.0, %v1746_v30  ;;  %v655_v56 = vadd.f32 %v519_v42, %v431_v60  ;;  %v555_v23 = vsel %vm1725_vm4, %v552_v1, %v549_v5 }
 0x15a   : > { %v1282_v21 = vpop.eup %1281  ;;  %vm1763_vm7 = vcmp.lt.f32.partialorder %v580_v3, 0.0004427343  ;;  %v567_v52 = vmul.f32 0.6931472, %v1274_v8  ;;  %1293 = vlog2.f32 %v610_v7  ;;  %v628_v54 = vadd.f32 1.0, %v1738_v22 }
 0x15b   : > { %v1284_v45 = vpop.eup %1283  ;;  %v558_v9 = vmul.f32 0.6931472, %v1280_v37  ;;  %v579_v57 = vmul.f32 %v1677_v33, %v578_v12  ;;  %vm1771_vm8 = vcmp.lt.f32.partialorder %v571_v35, 0.0004427343  ;;  %v598_v60 = vand.u32 2147483647, %v1687_v47  ;;  %1124 = vmatprep.mubr.msk.f32.mxu1 %vm686_vm3, %v655_v56 }
 0x15c   : > { %v1768_v62 = vpop.eup %1285  ;;  %v570_v48 = vmul.f32 %v1663_v15, %v569_v31  ;;  %v596_v0 = vadd.f32 1.0, %v595_v36  ;;  %v587_v1 = vadd.f32 1.0, %v586_v40  ;;  %v604_v3 = vmul.f32 -0.5, %v1698_v10  ;;  %1125 = vmatmul.mubr.msk.f32.vlgmr.msra.gmra.mrb[0].mxu1 %vm686_vm3, %v656_v46 }
 0x15d   : > { %v1288_v51 = vpop.eup %1287  ;;  %v658_v33 = vadd.f32 %v546_v39, %v434_v63  ;;  %v659_v8 = vadd.f32 %v555_v23, %v435_v18  ;;  %v589_v29 = vand.u32 2147483647, %v1681_v38  ;;  %1295 = vlog2.f32 %v637_v61  ;;  %1127 = vmatprep.mubr.msk.f32.mxu1 %vm686_vm3, %v657_v43 }
 0x15e   : > { %v573_v15 = vsel %vm1771_vm8, %v570_v48, %v567_v52  ;;  %v585_v12 = vmul.f32 0.6931472, %v1284_v45  ;;  %1297 = vlog2.f32 %v628_v54  ;;  %v646_v19 = vadd.f32 1.0, %v1768_v62 }
 0x15f   : > { %v1290_v5 = vpop.eup %1289  ;;  %v564_v2 = vsel %vm1740_vm5, %v1723_v49, %v558_v9  ;;  %v576_v63 = vmul.f32 0.6931472, %v1282_v21  ;;  %v594_v4 = vmul.f32 0.6931472, %v1288_v51  ;;  %v613_v18 = vmul.f32 -0.5, %v1720_v55 }
 0x160   : > { %vm1793_vm9 = vcmp.lt.f32.partialorder %v598_v60, 0.0004427343  ;;  %v588_v59 = vmul.f32 %v1681_v38, %v587_v1  ;;  %v605_v27 = vadd.f32 1.0, %v604_v3  ;;  %v622_v46 = vmul.f32 -0.5, %v1716_v41  ;;  %1128 = vmatmul.mubr.msk.f32.gmra.mrb[2].mxu1 %vm686_vm3, %v658_v33 }
 0x161   : > { %v661_v31 = vadd.f32 %v573_v15, %v437_v25  ;;  %v597_v49 = vmul.f32 %v1687_v47, %v596_v0  ;;  %vm1803_vm10 = vcmp.lt.f32.partialorder %v589_v29, 0.0004427343  ;;  %v607_v35 = vand.u32 2147483647, %v1698_v10  ;;  %1130 = vmatprep.mubr.msk.f32.mxu1 %vm686_vm3, %v659_v8 }
 0x162   : > { %v660_v38 = vadd.f32 %v564_v2, %v436_v16  ;;  %v591_v37 = vsel %vm1803_vm10, %v588_v59, %v585_v12  ;;  %v603_v39 = vmul.f32 0.6931472, %v1290_v5  ;;  %1299 = vlog2.f32 %v646_v19 }
 0x163   : > { %v1292_v11 = vpop.eup %1291  ;;  %v582_v25 = vsel %vm1763_vm7, %v579_v57, %v576_v63  ;;  %v600_v47 = vsel %vm1793_vm9, %v597_v49, %v594_v4  ;;  %v439_v36 = vmax.f32 %v1615_v24, 0.0  ;;  %v614_v40 = vadd.f32 1.0, %v613_v18 }
 0x164   : > { %v1294_v42 = vpop.eup %1293  ;;  %v606_v21 = vmul.f32 %v1698_v10, %v605_v27  ;;  %v631_v17 = vmul.f32 -0.5, %v1738_v22  ;;  %v623_v16 = vadd.f32 1.0, %v622_v46  ;;  %v640_v43 = vmul.f32 -0.5, %v1746_v30  ;;  %1131 = vmatmul.mubr.msk.f32.gmra.mrb[4].mxu1 %vm686_vm3, %v660_v38 }
 0x165   : > { %v440_v61 = vmax.f32 %v1619_v28, 0.0  ;;  %v663_v56 = vadd.f32 %v591_v37, %v439_v36  ;;  %vm1823_vm11 = vcmp.lt.f32.partialorder %v607_v35, 0.0004427343  ;;  %v625_v24 = vand.u32 2147483647, %v1716_v41  ;;  %1133 = vmatprep.mubr.msk.f32.mxu1 %vm686_vm3, %v661_v31 }
 0x166   : > { %v662_v10 = vadd.f32 %v582_v25, %v438_v58  ;;  %v616_v23 = vand.u32 2147483647, %v1720_v55  ;;  %v609_v32 = vsel %vm1823_vm11, %v606_v21, %v603_v39  ;;  %v621_v52 = vmul.f32 0.6931472, %v1292_v11 }
 0x167   : > { %v1296_v54 = vpop.eup %1295  ;;  %v664_v28 = vadd.f32 %v600_v47, %v440_v61  ;;  %v612_v9 = vmul.f32 0.6931472, %v1294_v42  ;;  %v441_v57 = vmax.f32 %v1624_v34, 0.0  ;;  %v615_v60 = vmul.f32 %v1720_v55, %v614_v40 }
 0x168   : > { %v1298_v13 = vpop.eup %1297  ;;  %v632_v51 = vadd.f32 1.0, %v631_v17  ;;  %v624_v48 = vmul.f32 %v1716_v41, %v623_v16  ;;  %v641_v0 = vadd.f32 1.0, %v640_v43  ;;  %1134 = vmatmul.mubr.msk.f32.gmra.mrb[6].mxu1 %vm686_vm3, %v662_v10  ;;  %vm1838_vm12 = vcmp.lt.f32.partialorder %v625_v24, 0.0004427343 }
 0x169   : > { %v665_v20 = vadd.f32 %v609_v32, %v441_v57  ;;  %v649_v1 = vmul.f32 -0.5, %v1768_v62  ;;  %v643_v3 = vand.u32 2147483647, %v1746_v30  ;;  %1136 = vmatprep.mubr.msk.f32.mxu1 %vm686_vm3, %v663_v56  ;;  %vm1845_vm13 = vcmp.lt.f32.partialorder %v616_v23, 0.0004427343 }
 0x16a   : > { %v634_v41 = vand.u32 2147483647, %v1738_v22  ;;  %v627_v55 = vsel %vm1838_vm12, %v624_v48, %v621_v52  ;;  %v639_v33 = vmul.f32 0.6931472, %v1296_v54  ;;  %v618_v8 = vsel %vm1845_vm13, %v615_v60, %v612_v9 }
 0x16b   : > { %v630_v29 = vmul.f32 0.6931472, %v1298_v13  ;;  %v443_v15 = vmax.f32 %v1640_v53, 0.0  ;;  %v442_v19 = vmax.f32 %v1629_v44, 0.0  ;;  %v642_v5 = vmul.f32 %v1746_v30, %v641_v0 }
 0x16c   : > { %v1300_v12 = vpop.eup %1299  ;;  %1137 = vmatmul.mubr.msk.f32.gmra.mrb[8].mxu1 %vm686_vm3, %v664_v28  ;;  %v633_v2 = vmul.f32 %v1738_v22, %v632_v51  ;;  %v650_v4 = vadd.f32 1.0, %v649_v1  ;;  %vm644_vm14 = vcmp.lt.f32.partialorder %v643_v3, 0.0004427343  ;;  %vm635_vm15 = vcmp.lt.f32.partialorder %v634_v41, 0.0004427343 }
 0x16d   : > { %v667_v63 = vadd.f32 %v627_v55, %v443_v15  ;;  %1139 = vmatprep.mubr.msk.f32.mxu1 %vm686_vm3, %v665_v20  ;;  %v666_v18 = vadd.f32 %v618_v8, %v442_v19  ;;  %v652_v7 = vand.u32 2147483647, %v1768_v62  ;;  %v645_v59 = vsel %vm644_vm14, %v642_v5, %v639_v33 }
 0x16e   : > { %v636_v53 = vsel %vm635_vm15, %v633_v2, %v630_v29  ;;  %v648_v27 = vmul.f32 0.6931472, %v1300_v12  ;;  %v445_v44 = vmax.f32 %v1661_v14, 0.0  ;;  %v444_v30 = vmax.f32 %v1636_v50, 0.0  ;;  %v976_v50 = vld [vmem:[%s1929_s4] ss:$0 sm:$0xff] }
 0x16f   : > { %v651_v22 = vmul.f32 %v1768_v62, %v650_v4  ;;  %vm653_vm0 = vcmp.lt.f32.partialorder %v652_v7, 0.0004427343  ;;  %v446_v26 = vmax.f32 %v1654_v6, 0.0  ;;  %vm880_vm1 = vcmask 31744  }
 0x170   : > { %1140 = vmatmul.mubr.msk.f32.gmra.mrb[10].mxu1 %vm686_vm3, %v666_v18  ;;  %v669_v46 = vadd.f32 %v645_v59, %v445_v44  ;;  %v668_v31 = vadd.f32 %v636_v53, %v444_v30 }
 0x171   : > { %1142 = vmatprep.mubr.msk.f32.mxu1 %vm686_vm3, %v667_v63  ;;  %v654_v49 = vsel %vm653_vm0, %v651_v22, %v648_v27 }
 0x172   : > { %v670_v35 = vadd.f32 %v654_v49, %v446_v26 }
 0x174   : > { %1143 = vmatmul.mubr.msk.f32.gmra.mrb[12].mxu1 %vm686_vm3, %v668_v31 }
 0x175   : > { %1145 = vmatprep.mubr.msk.f32.mxu1 %vm686_vm3, %v669_v46 }
 0x178   : > { %1146 = vmatmul.mubr.msk.f32.gmra.mrb[14].mxu1 %vm686_vm3, %v670_v35 }
 0x22f   : > { %v1126_v6 = vpop.f32.mrb[0].mxu1 }
 0x230   : > { %v807_v14 = vadd.f32 %v1126_v6, %v976_v50  ;;  %v801_v62 = vpop.f32.mrb[1].mxu1 }
 0x231   : > { %v802_v38 = vadd.f32 %v976_v50, %v801_v62 }
 0x232   : > { %882 = vst.msk [vmem:[%s1878_s16 + $0x8] sm:$0xff] %vm880_vm1, %v807_v14 }
 0x233   : > { %881 = vst.msk [vmem:[%s1878_s16] sm:$0xff] %vm880_vm1, %v802_v38  ;;  %v1129_v37 = vpop.f32.mrb[2].mxu1 }
 0x234   : > { %v817_v39 = vadd.f32 %v1129_v37, %v976_v50  ;;  %v811_v11 = vpop.f32.mrb[3].mxu1 }
 0x235   : > { %v812_v25 = vadd.f32 %v976_v50, %v811_v11 }
 0x236   : > { %884 = vst.msk [vmem:[%s1878_s16 + $0x18] sm:$0xff] %vm880_vm1, %v817_v39 }
 0x237   : > { %883 = vst.msk [vmem:[%s1878_s16 + $0x10] sm:$0xff] %vm880_vm1, %v812_v25  ;;  %v1132_v47 = vpop.f32.mrb[4].mxu1 }
 0x238   : > { %v827_v36 = vadd.f32 %v1132_v47, %v976_v50  ;;  %v821_v40 = vpop.f32.mrb[5].mxu1 }
 0x239   : > { %v822_v42 = vadd.f32 %v976_v50, %v821_v40 }
 0x23a   : > { %886 = vst.msk [vmem:[%s1878_s16 + $0x28] sm:$0xff] %vm880_vm1, %v827_v36 }
 0x23b   : > { %885 = vst.msk [vmem:[%s1878_s16 + $0x20] sm:$0xff] %vm880_vm1, %v822_v42  ;;  %v1135_v21 = vpop.f32.mrb[6].mxu1 }
 0x23c   : > { %v837_v17 = vadd.f32 %v1135_v21, %v976_v50  ;;  %v831_v16 = vpop.f32.mrb[7].mxu1 }
 0x23d   : > { %v832_v43 = vadd.f32 %v976_v50, %v831_v16 }
 0x23e   : > { %888 = vst.msk [vmem:[%s1878_s16 + $0x38] sm:$0xff] %vm880_vm1, %v837_v17 }
 0x23f   : > { %887 = vst.msk [vmem:[%s1878_s16 + $0x30] sm:$0xff] %vm880_vm1, %v832_v43  ;;  %v1138_v61 = vpop.f32.mrb[8].mxu1 }
 0x240   : > { %v847_v56 = vadd.f32 %v1138_v61, %v976_v50  ;;  %v841_v45 = vpop.f32.mrb[9].mxu1 }
 0x241   : > { %v842_v24 = vadd.f32 %v976_v50, %v841_v45 }
 0x242   : > { %890 = vst.msk [vmem:[%s1878_s16 + $0x48] sm:$0xff] %vm880_vm1, %v847_v56 }
 0x243   : > { %889 = vst.msk [vmem:[%s1878_s16 + $0x40] sm:$0xff] %vm880_vm1, %v842_v24  ;;  %v1141_v10 = vpop.f32.mrb[10].mxu1 }
 0x244   : > { %v857_v23 = vadd.f32 %v1141_v10, %v976_v50  ;;  %v851_v32 = vpop.f32.mrb[11].mxu1 }
 0x245   : > { %v852_v52 = vadd.f32 %v976_v50, %v851_v32 }
 0x246   : > { %892 = vst.msk [vmem:[%s1878_s16 + $0x58] sm:$0xff] %vm880_vm1, %v857_v23 }
 0x247   : > { %891 = vst.msk [vmem:[%s1878_s16 + $0x50] sm:$0xff] %vm880_vm1, %v852_v52  ;;  %v1144_v54 = vpop.f32.mrb[12].mxu1 }
 0x248   : > { %v867_v28 = vadd.f32 %v1144_v54, %v976_v50  ;;  %v861_v9 = vpop.f32.mrb[13].mxu1 }
 0x249   : > { %v862_v57 = vadd.f32 %v976_v50, %v861_v9 }
 0x24a   : > { %894 = vst.msk [vmem:[%s1878_s16 + $0x68] sm:$0xff] %vm880_vm1, %v867_v28 }
 0x24b   : > { %893 = vst.msk [vmem:[%s1878_s16 + $0x60] sm:$0xff] %vm880_vm1, %v862_v57  ;;  %v1147_v13 = vpop.f32.mrb[14].mxu1 }
 0x24c   : > { %v877_v60 = vadd.f32 %v1147_v13, %v976_v50  ;;  %v871_v51 = vpop.f32.mrb[15].mxu1 }
 0x24d   : > { %v872_v48 = vadd.f32 %v976_v50, %v871_v51 }
 0x24e   : > { %896 = vst.msk [vmem:[%s1878_s16 + $0x78] sm:$0xff] %vm880_vm1, %v877_v60 }
 0x24f   : > { %895 = vst.msk [vmem:[%s1878_s16 + $0x70] sm:$0xff] %vm880_vm1, %v872_v48 }
 0x250 PF: > { %p15_p8 = scmp.ge.s32.totalorder %s1420_s23, 6   ;;  %s1958_s18 = smov %s1357_s19 }
 0x251   : > { %s1959_s19 = smov %s1361_s20  ;;  %s1960_s20 = smov %s1430_s26 }
 0x252   : > { %s1961_s21 = smov %s1420_s23  ;;  %17 = sbr.rel (!%p15_p8) target bundleno = 3 (0x3), region = 80 }
 0x259   :  { %919 = vsyncpa [#allocation3], 1 }
 0x25a   :  { %921 = vsyncpa [#allocation3 + $0x1], 1 }

</bundles_post_ra>
